<compile_context>
chip_gen: v7x
topology: tpu7x:2x2x1
jax: 0.10.0
libtpu: 0.0.40
codegen_flags: <defaults>
</compile_context>

<pallas_src>
import jax
import jax.numpy as jnp
from jax import lax
from jax.experimental import pallas as pl
from jax.experimental.pallas import tpu as pltpu


# --------------------------------------------------------------------------
# Hardware-aware sizing helpers
# --------------------------------------------------------------------------
def _vmem_budget_and_limit():
    """(per-step double-buffered block budget, requested scoped VMEM limit)."""
    try:
        cap = int(getattr(pltpu.get_tpu_info(), "vmem_capacity_bytes", 0) or 0)
    except Exception:
        cap = 0
    if cap <= 0:
        cap = 64 * 1024 * 1024          # conservative (v7x-sized) default
    limit = min(cap // 2, 64 * 1024 * 1024)   # 32 MiB on v7x, 64 MiB on v5e/v6e
    budget = limit // 2                        # headroom for Mosaic scratch
    return budget, limit


def _divisors(n):
    return sorted({d for i in range(1, int(n ** 0.5) + 1) if n % i == 0
                   for d in (i, n // i)})


def _pick_block(n, unit_bytes, budget, other_steps, min_steps=8,
                min_block_bytes=512 * 1024, multiple=1):
    """Largest divisor of `n` whose double-buffered block fits `budget`,
    shrunk (but never into the tiny-block regime) until the total grid has
    >= min_steps steps (v7x megacore sharding + pipelining)."""
    divs = [d for d in _divisors(n) if d == n or d % multiple == 0]
    fits = [d for d in divs if d * unit_bytes <= budget] or [min(divs)]
    fits = sorted(fits, reverse=True)
    chosen = fits[0]
    for d in fits:
        if d * unit_bytes < min_block_bytes and d != fits[0]:
            break                       # do not shrink below ~0.5 MiB blocks
        chosen = d
        if other_steps * (n // d) >= min_steps:
            return d
    return chosen


# --------------------------------------------------------------------------
# Kernels
# --------------------------------------------------------------------------
def _merge_kernel_nhwc(x_ref, o_ref):
    # x_ref: (R, 2, Wh, 2C)  dim 1 = H parity, lane halves = W parity 0 / 1
    # o_ref: (R, Wh, 4C)
    C = o_ref.shape[-1] // 4
    # Channel-concat order matches the PyTorch module:
    #   [x[0::2,0::2], x[1::2,0::2], x[0::2,1::2], x[1::2,1::2]]
    parts = [x_ref[:, dh, :, dw * C:(dw + 1) * C]
             for (dh, dw) in ((0, 0), (1, 0), (0, 1), (1, 1))]
    o_ref[...] = jnp.concatenate(parts, axis=-1)   # one lane-dense store


def _copy_kernel(x_ref, o_ref):
    # C % 128 == 0 path: the 4-way routing lives entirely in the BlockSpecs.
    o_ref[...] = x_ref[...]


def _merge_kernel_nchw(x_ref, o_ref):
    # Fused NCHW path.
    # x_ref: (Mb, 2W)  rows = flattened (c, hh); lane j = dh*W + w
    # o_ref: (4, Mb, Wh); plane k holds parity (dh, dw) = (k % 2, k // 2)
    M, W2 = x_ref.shape
    W = W2 // 2
    x = x_ref[...]
    for k, (dh, dw) in enumerate(((0, 0), (1, 0), (0, 1), (1, 1))):
        o_ref[k] = lax.slice(x, (0, dh * W + dw), (M, (dh + 1) * W),
                             strides=(1, 2))


# --------------------------------------------------------------------------
# Wrappers
# --------------------------------------------------------------------------
def _patch_merge_nhwc(x):
    """NHWC in -> NHWC out (no layout glue)."""
    B, H, W, C = x.shape
    assert H % 2 == 0 and W % 2 == 0, "odd spatial dims not supported"
    Hh, Wh = H // 2, W // 2
    itemsize = jnp.dtype(x.dtype).itemsize
    budget, limit = _vmem_budget_and_limit()
    cost = pl.CostEstimate(flops=0, transcendentals=0,
                           bytes_accessed=2 * B * H * W * C * itemsize)

    # Free, contiguous reshape: H -> (Hh, 2) and (W, C) -> (Wh, 2*C).
    x5 = x.reshape(B, Hh, 2, Wh, 2 * C)
    out_shape = jax.ShapeDtypeStruct((B, Hh, Wh, 4 * C), x.dtype)

    if C % 128 == 0:
        # BlockSpec-routed path: lane slicing happens in the DMA descriptors,
        # the body is a dense copy, and the grid gains a parallel axis of 4.
        R = _pick_block(Hh, 2 * W * C * itemsize, budget, other_steps=4 * B)
        return pl.pallas_call(
            _copy_kernel,
            out_shape=out_shape,
            grid=(B, Hh // R, 4),
            in_specs=[pl.BlockSpec((None, R, None, Wh, C),
                                   lambda b, i, k: (b, i, k % 2, 0, k // 2))],
            out_specs=pl.BlockSpec((None, R, Wh, C),
                                   lambda b, i, k: (b, i, 0, k)),
            compiler_params=pltpu.CompilerParams(
                dimension_semantics=("parallel", "parallel", "parallel"),
                vmem_limit_bytes=limit),
            cost_estimate=cost,
        )(x5)

    # Generic path (C = 96 / 192 / anything): 4 lane-range loads, one dense
    # concatenated store per block.
    R = _pick_block(Hh, 8 * W * C * itemsize, budget, other_steps=B)
    return pl.pallas_call(
        _merge_kernel_nhwc,
        out_shape=out_shape,
        grid=(B, Hh // R),
        in_specs=[pl.BlockSpec((None, R, 2, Wh, 2 * C),
                               lambda b, i: (b, i, 0, 0, 0))],
        out_specs=pl.BlockSpec((None, R, Wh, 4 * C),
                               lambda b, i: (b, i, 0, 0)),
        compiler_params=pltpu.CompilerParams(
            dimension_semantics=("parallel", "parallel"),
            vmem_limit_bytes=limit),
        cost_estimate=cost,
    )(x5)


def _patch_merge_nchw_fused(x):
    """NCHW in -> NCHW out in a single HBM round trip (no XLA transposes)."""
    B, C, H, W = x.shape
    assert H % 2 == 0 and W % 2 == 0, "odd spatial dims not supported"
    Hh, Wh = H // 2, W // 2
    M = C * Hh
    itemsize = jnp.dtype(x.dtype).itemsize
    budget, limit = _vmem_budget_and_limit()

    # Free reshape: each flat row m = c*Hh + hh holds the two source H-rows
    # (2*hh, 2*hh+1) back to back in its 2*W lanes.
    xm = x.reshape(B, M, 2 * W)
    # Last-two block dims must be (mult of 8, full), hence multiple=8 on M.
    Mb = _pick_block(M, 8 * W * itemsize, budget, other_steps=B, multiple=8)

    out = pl.pallas_call(
        _merge_kernel_nchw,
        out_shape=jax.ShapeDtypeStruct((B, 4, M, Wh), x.dtype),
        grid=(B, M // Mb),
        in_specs=[pl.BlockSpec((None, Mb, 2 * W), lambda b, i: (b, i, 0))],
        out_specs=pl.BlockSpec((None, 4, Mb, Wh), lambda b, i: (b, 0, i, 0)),
        compiler_params=pltpu.CompilerParams(
            dimension_semantics=("parallel", "parallel"),
            vmem_limit_bytes=limit),
        cost_estimate=pl.CostEstimate(
            flops=0, transcendentals=0,
            bytes_accessed=2 * B * H * W * C * itemsize),
    )(xm)
    # Force compile/execute here so any lowering/runtime problem is surfaced
    # inside the caller's try/except (the fallback keeps the op functional).
    out = jax.block_until_ready(out)
    # Free reshape: (B, 4, C*Hh, Wh) -> (B, 4*C, Hh, Wh).
    return out.reshape(B, 4 * C, Hh, Wh)


_FUSED_NCHW_OK = True  # disabled after the first lowering failure, if any


def patch_merge(x, channel_first=True):
    """PatchMerge forward. x: (B, C, H, W) if channel_first else (B, H, W, C)."""
    global _FUSED_NCHW_OK
    if not channel_first:
        return _patch_merge_nhwc(x)

    if _FUSED_NCHW_OK:
        try:
            return _patch_merge_nchw_fused(x)
        except Exception:
            _FUSED_NCHW_OK = False  # toolchain can't lower the strided slice

    # TODO(synk): fallback path keeps two XLA layout transposes (~3x the HBM
    # traffic of the fused kernel); it is only taken when the fused NCHW
    # kernel fails to lower on the current Mosaic toolchain (or when this
    # function is traced under an outer jit where the except cannot fire).
    out = _patch_merge_nhwc(jnp.transpose(x, (0, 2, 3, 1)))
    return jnp.transpose(out, (0, 3, 1, 2))


# --------------------------------------------------------------------------
# Pure-JAX references (mirror the PyTorch module)
# --------------------------------------------------------------------------
def _patch_merge_ref_nchw(x):
    xs = [x[..., 0::2, 0::2], x[..., 1::2, 0::2],
          x[..., 0::2, 1::2], x[..., 1::2, 1::2]]
    return jnp.concatenate(xs, axis=1)


def _patch_merge_ref_nhwc(x):
    xs = [x[..., 0::2, 0::2, :], x[..., 1::2, 0::2, :],
          x[..., 0::2, 1::2, :], x[..., 1::2, 1::2, :]]
    return jnp.concatenate(xs, axis=-1)


if __name__ == "__main__":
    key = jax.random.PRNGKey(0)
    k0, k1 = jax.random.split(key)

    # 1) channel_first=True (module default): NCHW in / NCHW out.
    B, C, H, W = 2, 4, 16, 16
    x = jax.random.normal(k0, (B, C, H, W), dtype=jnp.float32)
    out = jax.block_until_ready(patch_merge(x, channel_first=True))
    ref = _patch_merge_ref_nchw(x)
    assert out.shape == (B, 4 * C, H // 2, W // 2), out.shape
    assert bool(jnp.allclose(out, ref)), "channel_first=True mismatch"

    # 2) channel_first=False: NHWC in / NHWC out (generic-C kernel).
    x_nhwc = jnp.transpose(x, (0, 2, 3, 1))
    out2 = jax.block_until_ready(patch_merge(x_nhwc, channel_first=False))
    ref2 = _patch_merge_ref_nhwc(x_nhwc)
    assert out2.shape == (B, H // 2, W // 2, 4 * C), out2.shape
    assert bool(jnp.allclose(out2, ref2)), "channel_first=False mismatch"

    # 3) channel_first=False with C % 128 == 0 (BlockSpec-routed path).
    x3 = jax.random.normal(k1, (1, 8, 8, 128), dtype=jnp.float32)
    out3 = jax.block_until_ready(patch_merge(x3, channel_first=False))
    ref3 = _patch_merge_ref_nhwc(x3)
    assert out3.shape == (1, 4, 4, 512), out3.shape
    assert bool(jnp.allclose(out3, ref3)), "aligned-C path mismatch"

    print("KERNEL_OK")
</pallas_src>

<mosaic_0001>
module attributes {stable_mosaic.version = 11 : i64} {
  func.func @_merge_kernel_nhwc(%arg0: i32, %arg1: i32, %arg2: memref<1x8x2x8x8xf32, #tpu.memory_space<vmem>>, %arg3: memref<1x8x8x16xf32, #tpu.memory_space<vmem>>) attributes {dimension_semantics = [#tpu.dimension_semantics<parallel>, #tpu.dimension_semantics<parallel>], iteration_bounds = array<i64: 2, 1>, scalar_prefetch = 0 : i64, scratch_operands = 0 : i64, tpu.core_type = #tpu.core_type<tc>, window_params = [{transform_indices = @transform_0, window_bounds = array<i64: 1, 8, 2, 8, 8>}, {transform_indices = @transform_1, window_bounds = array<i64: 1, 8, 8, 16>}]} {
    %c0 = arith.constant 0 : index
    %c0_0 = arith.constant 0 : index
    %c0_1 = arith.constant 0 : index
    %c0_2 = arith.constant 0 : index
    %c0_3 = arith.constant 0 : index
    %0 = vector.load %arg2[%c0, %c0_0, %c0_1, %c0_2, %c0_3] : memref<1x8x2x8x8xf32, #tpu.memory_space<vmem>>, vector<1x8x1x8x4xf32>
    %1 = vector.shape_cast %0 : vector<1x8x1x8x4xf32> to vector<8x8x4xf32>
    %c0_4 = arith.constant 0 : index
    %c0_5 = arith.constant 0 : index
    %c1 = arith.constant 1 : index
    %c0_6 = arith.constant 0 : index
    %c0_7 = arith.constant 0 : index
    %2 = vector.load %arg2[%c0_4, %c0_5, %c1, %c0_6, %c0_7] : memref<1x8x2x8x8xf32, #tpu.memory_space<vmem>>, vector<1x8x1x8x4xf32>
    %3 = vector.shape_cast %2 : vector<1x8x1x8x4xf32> to vector<8x8x4xf32>
    %c0_8 = arith.constant 0 : index
    %c0_9 = arith.constant 0 : index
    %c0_10 = arith.constant 0 : index
    %c0_11 = arith.constant 0 : index
    %c4 = arith.constant 4 : index
    %4 = vector.load %arg2[%c0_8, %c0_9, %c0_10, %c0_11, %c4] : memref<1x8x2x8x8xf32, #tpu.memory_space<vmem>>, vector<1x8x1x8x4xf32>
    %5 = vector.shape_cast %4 : vector<1x8x1x8x4xf32> to vector<8x8x4xf32>
    %c0_12 = arith.constant 0 : index
    %c0_13 = arith.constant 0 : index
    %c1_14 = arith.constant 1 : index
    %c0_15 = arith.constant 0 : index
    %c4_16 = arith.constant 4 : index
    %6 = vector.load %arg2[%c0_12, %c0_13, %c1_14, %c0_15, %c4_16] : memref<1x8x2x8x8xf32, #tpu.memory_space<vmem>>, vector<1x8x1x8x4xf32>
    %7 = vector.shape_cast %6 : vector<1x8x1x8x4xf32> to vector<8x8x4xf32>
    %8 = tpu.concatenate %1, %3, %5, %7 in 2 : vector<8x8x4xf32>, vector<8x8x4xf32>, vector<8x8x4xf32>, vector<8x8x4xf32> -> vector<8x8x16xf32>
    %c0_17 = arith.constant 0 : index
    %c0_18 = arith.constant 0 : index
    %c0_19 = arith.constant 0 : index
    %c0_20 = arith.constant 0 : index
    %9 = vector.load %arg3[%c0_17, %c0_18, %c0_19, %c0_20] : memref<1x8x8x16xf32, #tpu.memory_space<vmem>>, vector<1x8x8x16xf32>
    %10 = vector.shape_cast %9 : vector<1x8x8x16xf32> to vector<8x8x16xf32>
    %11 = vector.shape_cast %8 : vector<8x8x16xf32> to vector<1x8x8x16xf32>
    tpu.vector_store %arg3[%c0_17, %c0_18, %c0_19, %c0_20], %11 {strides = array<i32>} : memref<1x8x8x16xf32, #tpu.memory_space<vmem>>, vector<1x8x8x16xf32>,
    return
  }
  func.func @transform_0(%arg0: i32, %arg1: i32) -> (i32, i32, i32, i32, i32) {
    %c0_i32 = arith.constant 0 : i32
    %c0_i32_0 = arith.constant 0 : i32
    %c0_i32_1 = arith.constant 0 : i32
    %c0_i32_2 = arith.constant 0 : i32
    return %arg0, %arg1, %c0_i32, %c0_i32_0, %c0_i32_1 : i32, i32, i32, i32, i32
  }
  func.func @transform_1(%arg0: i32, %arg1: i32) -> (i32, i32, i32, i32) {
    %c0_i32 = arith.constant 0 : i32
    %c0_i32_0 = arith.constant 0 : i32
    %c0_i32_1 = arith.constant 0 : i32
    return %arg0, %arg1, %c0_i32, %c0_i32_0 : i32, i32, i32, i32
  }
}

</mosaic_0001>

<bundles_post_ra>
// kernel: tpu_custom_call.1
= control target key start
LH: loop header
LB: loop body
LE: loop exit
PB: predicated region body
PF: predicated region fallthrough
CT: control target
= control target key end

     0   :  { %6 = vsyncpa [#allocation3], 0  ;;  %s877_s0 = inlined_call_operand.hbm [shape: f32[2,8,2,8,8], index: 0, kind: input, shape index: {}]   ;;  %s878_s1 = inlined_call_operand.hbm [shape: f32[2,8,8,16], index: 1, kind: output, shape index: {}]  }
   0x1   :  { %8 = vsyncpa [#allocation3 + $0x1], 0 }
   0x2   :  { %9 = vsyncpa [#allocation4], 0 }
   0x3   :  { %11 = vsyncpa [#allocation4 + $0x1], 0  ;;  %s623_s6 = smov 0   ;;  %s625_s7 = smov 0  }
   0x4   :  { %s627_s8 = smov 0   ;;  %s629_s9 = smov 0  }
   0x5   :  { %s631_s10 = smov 0   ;;  %s633_s11 = smov 0  }
   0x6 LB: > { %s400_s12 = sadd.s32 4294967295, %s604_s11   ;;  %s401_s13 = sadd.s32 4294967294, %s604_s11   ;;  %s604_s11 = sphi %s633_s11, %s17_s11   ;;  %s600_s10 = sphi %s631_s10, %s893_s10   ;;  %s596_s9 = sphi %s629_s9, %s892_s9   ;;  %s592_s8 = sphi %s627_s8, %s891_s8   ;;  %s588_s7 = sphi %s625_s7, %s890_s7   ;;  %s584_s6 = sphi %s623_s6, %s889_s6  }
   0x7   : > { %s29_s14 = sadd.s32 1, %s600_s10  ;;  %s38_s15 = sadd.s32 1, %s592_s8 }
   0x8   : > { %p31_p0 = scmp.ge.s32.totalorder %s29_s14, 2  ;;  %p45_p1 = scmp.ne.s32.totalorder %s592_s8, %s588_s7 }
   0x9   : > { %p46_p2 = scmp.eq.s32.totalorder %s604_s11, 0  ;;  %p51_p3 = scmp.ne.s32.totalorder %s588_s7, %s584_s6 }
   0xa   : > { %s895_s14 = smov (%p31_p0, %s29_s14), 0  ;;  %p52_p5 = scmp.eq.s32.totalorder %s400_s12, 0 }
   0xb   : > { %p664_p4 = por %p46_p2, %p45_p1  ;;  %s33_s17 = ssub.s32 %s600_s10, %s895_s14 }
   0xc   : > { %p77_p6 = scmp.eq.s32.totalorder %s400_s12, 1  ;;  %p36_p7 = scmp.eq.s32.totalorder %s33_s17, 0 }
   0xd   : > { %p670_p8 = por %p52_p5, %p51_p3  ;;  %p83_p10 = scmp.eq.s32.totalorder %s401_s13, 1 }
   0xe   : > { %p674_p9 = por %p77_p6, %p45_p1  ;;  %p437_p13 = scmp.lt.s32.totalorder %s604_s11, 2 }
   0xf   : > { %s679_s20 = scalar_select %p36_p7, %s592_s8, %s38_s15  }
  0x10   : > { %s882_s19 = scalar_select %p674_p9, 1, 0 }
  0x11   : > { %p681_p11 = por %p83_p10, %p51_p3  ;;  %s103_s22 = sand.u32 1, %s592_s8  }
  0x12   : > { %s404_s23 = sshll.u32 %s103_s22, 7  ;;  %s423_s24 = sshll.u32 %s600_s10, 11 }
  0x13   : > { %s883_s21 = scalar_select %p681_p11, 1, 0 }
  0x14   : > { %s692_s27 = scalar_lea.hbm %s877_s0, %s423_s24  ;;  %s107_s28 = scalar_lea.vmem [#allocation2], %s404_s23 }
  0x15   : > { %s117_s29 = sshll.u32 %s107_s28, 4  ;;  %p698_p0 = pnand %p437_p13, %p664_p4  ;;  %s694_s29 = int_to_ptr.vmem [resolvable:$true] %s117_s29 }
  0x16   : > { %s703_s2 = scalar_lea.sflag [#allocation3], %s103_s22  ;;  %s492_s3 = scalar_lea.hbm %s692_s27, 2048 }
  0x17   : > { %p493_p2 = scmp.ne.s32.totalorder %s692_s27, %s492_s3  ;;  %p494_p3 = pneg %p698_p0 }
  0x18   : > { %s497_s12 = scalar_lea.hbm %s877_s0, 4096  ;;  %p498_p4 = scmp.lt.u32.totalorder %s692_s27, %s877_s0 }
  0x19   : > { %p495_p5 = pnand %p494_p3, %p493_p2  ;;  %p499_p7 = scmp.lt.u32.totalorder %s497_s12, %s492_s3 }
  0x1a   : > { %p501_p13 = scmp.lt.u32.totalorder %s492_s3, %s692_s27 }
  0x1b   : > { %p496_p6 = pneg %p495_p5  ;;  %p500_p10 = por %p499_p7, %p498_p4 }
  0x1d   : > { %p502_p12 = por %p501_p13, %p500_p10 }
  0x1f   : > { %p503_p1 = pnand %p502_p12, %p496_p6 }
  0x21   : > { %506 = shalt.err (!%p503_p1)
}
  0x22   : > { %s507_s16 = scalar_lea.vmem %s694_s29, 2048  ;;  %s606_s17 = smov [#allocation2]  }
  0x23   : > { %p508_p2 = scmp.ne.s32.totalorder %s694_s29, %s507_s16  ;;  %s512_s22 = sshll.u32 %s606_s17, 4  ;;  %s513_s22 = int_to_ptr.vmem [resolvable:$false] %s512_s22 }
  0x24   : > { %s514_s23 = scalar_lea.vmem %s513_s22, 4096  ;;  %p515_p9 = scmp.lt.s32.totalorder %s694_s29, %s513_s22 }
  0x25   : > { %p510_p5 = pnand %p508_p2, %p494_p3  ;;  %p516_p4 = scmp.lt.s32.totalorder %s514_s23, %s507_s16 }
  0x27   : > { %p511_p11 = pneg %p510_p5  ;;  %p517_p7 = por %p516_p4, %p515_p9 }
  0x29   : > { %p518_p10 = pnand %p517_p7, %p511_p11 }
  0x2b   : > { %521 = shalt.err (!%p518_p10)
}
  0x2c   : > { %s607_s24 = smov 128   ;;  %s608_s25 = smov 8  }
  0x2d   : > { %432 = dma.hbm_to_vmem [thread:$0]  (!%p698_p0), %s692_s27, 2048, %s694_s29, %s703_s2, %s607_s24, %s607_s24, %s608_s25  }
  0x2e   : > { %p125_p12 = scmp.lt.s32.totalorder %s604_s11, 3  ;;  %p885_p1 = scmp.ge.s32.totalorder %s604_s11, 1 }
  0x30   : > { %p126_p3 = pnand %p885_p1, %p125_p12 }
  0x31   : > { %s735_s26 = sand.u32 (!%p126_p3), 1, %s588_s7  }
  0x32   : > { %129 = sbr.rel (%p126_p3) target bundleno = 235 (0xeb), region = 24  ;;  %s408_s28 = sshll.u32 (!%p126_p3), %s735_s26, 7 }
  0x33   : > { %s132_s3 = scalar_lea.sflag (!%p126_p3), [#allocation3], %s735_s26  ;;  %s739_s4 = scalar_lea.vmem (!%p126_p3), [#allocation2], %s408_s28 }
  0x39   : > { %575 = dma.done.wait (%p670_p8), %s132_s3, 2048  }
  0x3a   : > { %577 = vsyncadd (%p670_p8), %s132_s3, 4294965248  ;;  %v412_v0 = vld [vmem:[%s739_s4 + $0x28] sm:$0xff]  ;;  %s609_s27 = smov 4   ;;  %v413_v2 = vld [vmem:[%s739_s4 + $0x38] sm:$0xff]  ;;  %s610_s18 = smov 8   ;;  %vm261_vm0 = vcmask 31744  }
  0x3b   : > { %v410_v1 = vld [vmem:[%s739_s4 + $0x8] sm:$0xff]  ;;  %185 = vrot.lane.b32.xlu1 %v412_v0, %s609_s27  ;;  %v411_v3 = vld [vmem:[%s739_s4 + $0x18] sm:$0xff]  ;;  %v157_v8 = vld [vmem:[%s739_s4 + $0x10] sm:$0xff]  ;;  %s409_s29 = sshll.u32 %s735_s26, 6  ;;  %vm270_vm1 = vcmask 64512   ;;  %vm279_vm2 = vcmask 97280  }
  0x3c   : > { %181 = vrot.lane.b32.xlu0 %v410_v1, %s609_s27  ;;  %v415_v4 = vld [vmem:[%s739_s4 + $0x58] sm:$0xff]  ;;  %v414_v5 = vld [vmem:[%s739_s4 + $0x48] sm:$0xff]  ;;  %v156_v9 = vld [vmem:[%s739_s4] sm:$0xff]  ;;  %vm288_vm3 = vcmask 130048   ;;  %s782_s30 = scalar_lea.vmem [#allocation5], %s409_s29  ;;  %s424_s5 = sshll.u32 %s596_s9, 10 }
  0x3d   : > { %v417_v6 = vld [vmem:[%s739_s4 + $0x78] sm:$0xff]  ;;  %v416_v7 = vld [vmem:[%s739_s4 + $0x68] sm:$0xff]  ;;  %v159_v10 = vld [vmem:[%s739_s4 + $0x30] sm:$0xff]  ;;  %s313_s2 = sshll.u32 %s782_s30, 4  ;;  %s821_s13 = scalar_lea.hbm %s878_s1, %s424_s5  ;;  %s814_s2 = int_to_ptr.vmem [resolvable:$true] %s313_s2 }
  0x3e   : > { %v158_v11 = vld [vmem:[%s739_s4 + $0x20] sm:$0xff]  ;;  %v161_v12 = vld [vmem:[%s739_s4 + $0x50] sm:$0xff]  ;;  %s298_s15 = scalar_lea.sflag [#allocation4], %s735_s26  ;;  %s522_s16 = scalar_lea.vmem %s814_s2, 1024 }
  0x3f   : > { %187 = vrot.lane.b32.xlu1 %v413_v2, %s609_s27  ;;  %v160_v13 = vld [vmem:[%s739_s4 + $0x40] sm:$0xff]  ;;  %v760_v14 = vld [vmem:[%s739_s4 + $0x70] sm:$0xff]  ;;  %p523_p8 = scmp.ne.s32.totalorder %s814_s2, %s522_s16  ;;  %p886_p9 = scmp.ne.s32.totalorder %s882_s19, 0 }
  0x40   : > { %183 = vrot.lane.b32.xlu0 %v411_v3, %s609_s27  ;;  %v763_v15 = vld [vmem:[%s739_s4 + $0x60] sm:$0xff]  ;;  %s611_s17 = smov [#allocation5]  }
  0x41   : > { %p524_p11 = pnand %p523_p8, %p886_p9  ;;  %s526_s22 = sshll.u32 %s611_s17, 4  ;;  %s527_s22 = int_to_ptr.vmem [resolvable:$false] %s526_s22 }
  0x42   : > { %s528_s23 = scalar_lea.vmem %s527_s22, 2048  ;;  %p529_p6 = scmp.lt.s32.totalorder %s814_s2, %s527_s22 }
  0x43   : > { %191 = vrot.lane.b32.xlu1 %v415_v4, %s609_s27  ;;  %p525_p0 = pneg %p524_p11  ;;  %p530_p13 = scmp.lt.s32.totalorder %s528_s23, %s522_s16 }
  0x44   : > { %189 = vrot.lane.b32.xlu0 %v414_v5, %s609_s27 }
  0x45   : > { %p531_p2 = por %p530_p13, %p529_p6 }
  0x47   : > { %195 = vrot.lane.b32.xlu1 %v417_v6, %s609_s27  ;;  %p532_p5 = pnand %p531_p2, %p525_p0 }
  0x48   : > { %193 = vrot.lane.b32.xlu0 %v416_v7, %s609_s27 }
  0x4b   : > { %215 = vrot.lane.b32.xlu1 %v157_v8, %s609_s27 }
  0x4c   : > { %213 = vrot.lane.b32.xlu0 %v156_v9, %s609_s27 }
  0x4f   : > { %219 = vrot.lane.b32.xlu1 %v159_v10, %s609_s27 }
  0x50   : > { %217 = vrot.lane.b32.xlu0 %v158_v11, %s609_s27 }
  0x53   : > { %223 = vrot.lane.b32.xlu1 %v161_v12, %s609_s27 }
  0x54   : > { %221 = vrot.lane.b32.xlu0 %v160_v13, %s609_s27 }
  0x57   : > { %227 = vrot.lane.b32.xlu1 %v760_v14, %s609_s27 }
  0x58   : > { %225 = vrot.lane.b32.xlu0 %v763_v15, %s609_s27 }
  0x5b   : > { %239 = vrot.lane.b32.xlu1 %v411_v3, %s610_s18 }
  0x5c   : > { %237 = vrot.lane.b32.xlu0 %v410_v1, %s610_s18 }
  0x5f   : > { %243 = vrot.lane.b32.xlu1 %v413_v2, %s610_s18 }
  0x60   : > { %241 = vrot.lane.b32.xlu0 %v412_v0, %s610_s18 }
  0x63   : > { %247 = vrot.lane.b32.xlu1 %v415_v4, %s610_s18 }
  0x64   : > { %245 = vrot.lane.b32.xlu0 %v414_v5, %s610_s18 }
  0x67   : > { %251 = vrot.lane.b32.xlu1 %v417_v6, %s610_s18 }
  0x68   : > { %249 = vrot.lane.b32.xlu0 %v416_v7, %s610_s18 }
  0xad   : > { %v186_v16 = vpop.permute.xlu1 %185 }
  0xae   : > { %v182_v17 = vpop.permute.xlu0 %181  ;;  %v264_v40 = vsel %vm261_vm0, %v158_v11, %v186_v16 }
  0xaf   : > { %v262_v32 = vsel %vm261_vm0, %v156_v9, %v182_v17 }
  0xb1   : > { %v188_v18 = vpop.permute.xlu1 %187 }
  0xb2   : > { %v184_v19 = vpop.permute.xlu0 %183  ;;  %v265_v41 = vsel %vm261_vm0, %v159_v10, %v188_v18 }
  0xb3   : > { %v263_v33 = vsel %vm261_vm0, %v157_v8, %v184_v19 }
  0xb5   : > { %v192_v20 = vpop.permute.xlu1 %191 }
  0xb6   : > { %v190_v21 = vpop.permute.xlu0 %189  ;;  %v267_v48 = vsel %vm261_vm0, %v161_v12, %v192_v20 }
  0xb7   : > { %v266_v49 = vsel %vm261_vm0, %v160_v13, %v190_v21 }
  0xb9   : > { %v196_v22 = vpop.permute.xlu1 %195 }
  0xba   : > { %v194_v23 = vpop.permute.xlu0 %193  ;;  %v269_v56 = vsel %vm261_vm0, %v760_v14, %v196_v22 }
  0xbb   : > { %v268_v57 = vsel %vm261_vm0, %v763_v15, %v194_v23 }
  0xbd   : > { %v216_v24 = vpop.permute.xlu1 %215 }
  0xbe   : > { %v214_v25 = vpop.permute.xlu0 %213  ;;  %v272_v34 = vsel %vm270_vm1, %v263_v33, %v216_v24 }
  0xbf   : > { %v271_v35 = vsel %vm270_vm1, %v262_v32, %v214_v25 }
  0xc1   : > { %v220_v26 = vpop.permute.xlu1 %219 }
  0xc2   : > { %v218_v27 = vpop.permute.xlu0 %217  ;;  %v274_v42 = vsel %vm270_vm1, %v265_v41, %v220_v26 }
  0xc3   : > { %v273_v43 = vsel %vm270_vm1, %v264_v40, %v218_v27 }
  0xc5   : > { %v224_v28 = vpop.permute.xlu1 %223 }
  0xc6   : > { %v222_v29 = vpop.permute.xlu0 %221  ;;  %v276_v50 = vsel %vm270_vm1, %v267_v48, %v224_v28 }
  0xc7   : > { %v275_v51 = vsel %vm270_vm1, %v266_v49, %v222_v29 }
  0xc9   : > { %v228_v30 = vpop.permute.xlu1 %227 }
  0xca   : > { %v226_v31 = vpop.permute.xlu0 %225  ;;  %v278_v58 = vsel %vm270_vm1, %v269_v56, %v228_v30 }
  0xcb   : > { %v277_v59 = vsel %vm270_vm1, %v268_v57, %v226_v31 }
  0xcd   : > { %v240_v36 = vpop.permute.xlu1 %239 }
  0xce   : > { %v238_v37 = vpop.permute.xlu0 %237  ;;  %v281_v38 = vsel %vm279_vm2, %v272_v34, %v240_v36 }
  0xcf   : > { %v280_v39 = vsel %vm279_vm2, %v271_v35, %v238_v37  ;;  %290 = vst.msk [vmem:[%s782_s30 + $0x8] sm:$0xff] %vm288_vm3, %v281_v38 }
  0xd0   : > { %289 = vst.msk [vmem:[%s782_s30] sm:$0xff] %vm288_vm3, %v280_v39 }
  0xd1   : > { %v244_v44 = vpop.permute.xlu1 %243 }
  0xd2   : > { %v242_v45 = vpop.permute.xlu0 %241  ;;  %v283_v46 = vsel %vm279_vm2, %v274_v42, %v244_v44 }
  0xd3   : > { %v282_v47 = vsel %vm279_vm2, %v273_v43, %v242_v45  ;;  %292 = vst.msk [vmem:[%s782_s30 + $0x18] sm:$0xff] %vm288_vm3, %v283_v46 }
  0xd4   : > { %291 = vst.msk [vmem:[%s782_s30 + $0x10] sm:$0xff] %vm288_vm3, %v282_v47 }
  0xd5   : > { %v248_v52 = vpop.permute.xlu1 %247 }
  0xd6   : > { %v246_v53 = vpop.permute.xlu0 %245  ;;  %v285_v54 = vsel %vm279_vm2, %v276_v50, %v248_v52 }
  0xd7   : > { %v284_v55 = vsel %vm279_vm2, %v275_v51, %v246_v53  ;;  %294 = vst.msk [vmem:[%s782_s30 + $0x28] sm:$0xff] %vm288_vm3, %v285_v54 }
  0xd8   : > { %293 = vst.msk [vmem:[%s782_s30 + $0x20] sm:$0xff] %vm288_vm3, %v284_v55 }
  0xd9   : > { %v252_v60 = vpop.permute.xlu1 %251 }
  0xda   : > { %v250_v61 = vpop.permute.xlu0 %249  ;;  %v287_v62 = vsel %vm279_vm2, %v278_v58, %v252_v60 }
  0xdb   : > { %v286_v63 = vsel %vm279_vm2, %v277_v59, %v250_v61  ;;  %296 = vst.msk [vmem:[%s782_s30 + $0x38] sm:$0xff] %vm288_vm3, %v287_v62 }
  0xdc   : > { %295 = vst.msk [vmem:[%s782_s30 + $0x30] sm:$0xff] %vm288_vm3, %v286_v63 }
  0xdd   : > { %535 = shalt.err (!%p532_p5)
}
  0xde   : > { %s536_s24 = scalar_lea.hbm %s821_s13, 1024  ;;  %s540_s3 = scalar_lea.hbm %s878_s1, 2048 }
  0xdf   : > { %p537_p4 = scmp.ne.s32.totalorder %s821_s13, %s536_s24  ;;  %p541_p12 = scmp.lt.u32.totalorder %s821_s13, %s878_s1 }
  0xe0   : > { %p542_p1 = scmp.lt.u32.totalorder %s540_s3, %s536_s24  ;;  %p544_p8 = scmp.lt.u32.totalorder %s536_s24, %s821_s13 }
  0xe1   : > { %p538_p7 = pnand %p537_p4, %p886_p9 }
  0xe2   : > { %p543_p3 = por %p542_p1, %p541_p12 }
  0xe3   : > { %p539_p10 = pneg %p538_p7 }
  0xe4   : > { %p545_p11 = por %p544_p8, %p543_p3 }
  0xe6   : > { %p546_p0 = pnand %p545_p11, %p539_p10 }
  0xe8   : > { %549 = shalt.err (!%p546_p0)
}
  0xe9   : > { %s612_s29 = smov 128  }
  0xea   : > { %427 = dma.vmem_to_hbm [thread:$0]  (%p886_p9), %s814_s2, 1024, %s821_s13, %s298_s15, %s612_s29, %s612_s29, %s610_s18  }
  0xeb PF: > { %s328_s30 = sand.u32 1, %s584_s6   ;;  %p887_p6 = scmp.ne.s32.totalorder %s883_s21, 0 }
  0xec   : > { %p888_p13 = scmp.ge.s32.totalorder %s604_s11, 2  ;;  %s329_s5 = scalar_lea.sflag [#allocation4], %s328_s30 }
  0xee   : > { %p434_p2 = pnand %p888_p13, %p887_p6 }
  0xf0   : > { %579 = dma.done.wait (!%p434_p2), %s329_s5, 1024  }
  0xf1   : > { %581 = vsyncadd (!%p434_p2), %s329_s5, 4294966272  ;;  %s17_s11 = sadd.s32 1, %s604_s11   ;;  %s889_s6 = smov %s588_s7 }
  0xf2   : > { %p14_p5 = scmp.ge.s32.totalorder %s17_s11, 4   ;;  %s890_s7 = smov %s592_s8 }
  0xf3   : > { %s891_s8 = smov %s679_s20  ;;  %s892_s9 = smov %s600_s10 }
  0xf4   : > { %s893_s10 = smov %s895_s14  ;;  %16 = sbr.rel (!%p14_p5) target bundleno = 6 (0x6), region = 70 }
  0xfb   :  { %334 = vsyncpa [#allocation3], 1 }
  0xfc   :  { %336 = vsyncpa [#allocation3 + $0x1], 1 }
  0xfd   :  { %337 = vsyncpa [#allocation4], 1 }
  0xfe   :  { %339 = vsyncpa [#allocation4 + $0x1], 1 }

</bundles_post_ra>
